<compile_context>
chip_gen: v5e
topology: v5e:2x2
jax: 0.10.0
libtpu: 0.0.40
codegen_flags: <defaults>
</compile_context>

<pallas_src>
import jax
import jax.numpy as jnp
from jax.experimental import pallas as pl
from jax.experimental.pallas import tpu as pltpu


def mlp_softmax_kernel(x_ref, w1_ref, b1_ref, w2_ref, b2_ref, o_ref):
    # x: [TB, F]  w1: [F, H_PAD]  b1: [1, H_PAD]  w2: [H_PAD, N]  b2: [1, N]
    # o: [TB, N]
    x = x_ref[...]

    # Linear(num_inputs, 5) (hidden zero-padded to 8) + ReLU.  K=F -> MXU.
    h = jnp.dot(x, w1_ref[...], preferred_element_type=jnp.float32) + b1_ref[...]
    h = jnp.maximum(h, 0.0)

    # Linear(5, 20): K=8 (padded) contraction on the (otherwise idle) MXU.
    logits = jnp.dot(h, w2_ref[...], preferred_element_type=jnp.float32)
    logits = logits + b2_ref[...].astype(jnp.float32)

    # Dropout(p=0.3): identity in eval/inference mode.
    # TODO(synk): pltpu PRNG mask + 1/0.7 scaling for training-mode forward.

    # Row-wise numerically stable softmax; divide -> EUP approx reciprocal.
    m = jnp.max(logits, axis=1, keepdims=True)
    e = jnp.exp(logits - m)
    denom = jnp.sum(e, axis=1, keepdims=True)
    o_ref[...] = (e * pl.reciprocal(denom, approx=True)).astype(o_ref.dtype)


def _round_up(n, m):
    return (n + m - 1) // m * m


def _choose_batch_tile(B, tb_max=16384, min_steps=2):
    """Pick (TB, B_PAD): big tiles, >=min_steps grid steps when splittable,
    and padding kept to < one sublane group beyond the natural multiple-of-8."""
    B8 = _round_up(B, 8)
    # At least min_steps steps (v7x megacore) unless the batch is too small
    # to split at f32 sublane (8-row) granularity.
    n_steps = max(pl.cdiv(B8, tb_max), min(min_steps, B8 // 8), 1)
    TB = _round_up(pl.cdiv(B8, n_steps), 8)
    B_PAD = _round_up(B, TB)
    return TB, B_PAD


def our_module_forward(x, w1, b1, w2, b2, *, tb_max=16384, min_steps=2):
    """x: [B, F]; w1: [F, 5]; b1: [1, 5]; w2: [5, 20]; b2: [1, 20] -> [B, 20]."""
    B, F = x.shape
    H = w1.shape[1]
    N = w2.shape[1]

    # Zero-pad hidden dim 5 -> 8 (f32 sublane granularity).  Exact:
    # ReLU(x @ 0 + 0) = 0 feeds zero rows of W2.
    H_PAD = _round_up(H, 8)
    w1p = jnp.pad(w1, ((0, 0), (0, H_PAD - H)))
    b1p = jnp.pad(b1, ((0, 0), (0, H_PAD - H)))
    w2p = jnp.pad(w2, ((0, H_PAD - H), (0, 0)))

    # Batch tiling: large B-aware tile, small padding, >=2 grid steps when
    # the batch is splittable (keeps both v7x TensorCores busy).
    TB, B_PAD = _choose_batch_tile(B, tb_max=tb_max, min_steps=min_steps)
    # Skip the wrapper-side pad copy entirely when not needed (it would be a
    # separate full-HBM-traffic XLA op on a bandwidth-bound kernel).
    xp = x if B_PAD == B else jnp.pad(x, ((0, B_PAD - B), (0, 0)))

    out = pl.pallas_call(
        mlp_softmax_kernel,
        out_shape=jax.ShapeDtypeStruct((B_PAD, N), jnp.float32),
        grid_spec=pltpu.PrefetchScalarGridSpec(
            num_scalar_prefetch=0,
            grid=(B_PAD // TB,),
            in_specs=[
                pl.BlockSpec((TB, F), lambda i: (i, 0)),        # x tile (pipelined)
                pl.BlockSpec((F, H_PAD), lambda i: (0, 0)),     # W1 resident
                pl.BlockSpec((1, H_PAD), lambda i: (0, 0)),     # b1 resident
                pl.BlockSpec((H_PAD, N), lambda i: (0, 0)),     # W2 resident
                pl.BlockSpec((1, N), lambda i: (0, 0)),         # b2 resident
            ],
            out_specs=pl.BlockSpec((TB, N), lambda i: (i, 0)),
        ),
        compiler_params=pltpu.CompilerParams(
            dimension_semantics=("parallel",),   # shards batch over v7x's 2 TCs
            vmem_limit_bytes=32 * 1024 * 1024,   # guard v5e's 16 MiB default
        ),
    )(xp, w1p, b1p, w2p, b2)
    return out[:B]


def _reference(x, w1, b1, w2, b2):
    h = jnp.maximum(x @ w1 + b1, 0.0)
    logits = h @ w2 + b2
    return jax.nn.softmax(logits, axis=1)


if __name__ == "__main__":
    # Shapes consistent with the module's forward:
    #   num_inputs = 32, hidden = 5, num_classes-ish output = 20, batch = 8
    B, NUM_INPUTS, HIDDEN, OUT = 8, 32, 5, 20

    key = jax.random.PRNGKey(0)
    k_x, k_w1, k_b1, k_w2, k_b2, k_x2 = jax.random.split(key, 6)

    x = jax.random.normal(k_x, (B, NUM_INPUTS), dtype=jnp.float32)

    # Deterministic parameter init (uniform, PyTorch-Linear-style bounds).
    bound1 = 1.0 / (NUM_INPUTS ** 0.5)
    w1 = jax.random.uniform(k_w1, (NUM_INPUTS, HIDDEN), jnp.float32, -bound1, bound1)
    b1 = jax.random.uniform(k_b1, (1, HIDDEN), jnp.float32, -bound1, bound1)

    bound2 = 1.0 / (HIDDEN ** 0.5)
    w2 = jax.random.uniform(k_w2, (HIDDEN, OUT), jnp.float32, -bound2, bound2)
    b2 = jax.random.uniform(k_b2, (1, OUT), jnp.float32, -bound2, bound2)

    # Case 1: small batch (single-tile path, grid=(1,)).
    out = jax.block_until_ready(our_module_forward(x, w1, b1, w2, b2))
    ref = _reference(x, w1, b1, w2, b2)
    assert out.shape == (B, OUT)
    assert jnp.max(jnp.abs(out - ref)) < 5e-3
    assert jnp.allclose(jnp.sum(out, axis=1), jnp.ones((B,), jnp.float32), atol=2e-2)

    # Case 2: ragged batch (exercises multi-step grid + small batch padding).
    B2 = 50
    x2 = jax.random.normal(k_x2, (B2, NUM_INPUTS), dtype=jnp.float32)
    out2 = jax.block_until_ready(our_module_forward(x2, w1, b1, w2, b2))
    ref2 = _reference(x2, w1, b1, w2, b2)
    assert out2.shape == (B2, OUT)
    assert jnp.max(jnp.abs(out2 - ref2)) < 5e-3
    assert jnp.allclose(jnp.sum(out2, axis=1), jnp.ones((B2,), jnp.float32), atol=2e-2)

    # Case 3: larger batch (exercises the big-tile / tb_max path with >=2 steps).
    B3 = 3000
    x3 = jax.random.normal(k_x2, (B3, NUM_INPUTS), dtype=jnp.float32)
    out3 = jax.block_until_ready(our_module_forward(x3, w1, b1, w2, b2))
    ref3 = _reference(x3, w1, b1, w2, b2)
    assert out3.shape == (B3, OUT)
    assert jnp.max(jnp.abs(out3 - ref3)) < 5e-3

    print("KERNEL_OK")
</pallas_src>

<mosaic_0001>
module attributes {stable_mosaic.version = 11 : i64} {
  func.func @mlp_softmax_kernel(%arg0: i32, %arg1: memref<8x32xf32, #tpu.memory_space<vmem>>, %arg2: memref<32x8xf32, #tpu.memory_space<vmem>>, %arg3: memref<1x8xf32, #tpu.memory_space<vmem>>, %arg4: memref<8x20xf32, #tpu.memory_space<vmem>>, %arg5: memref<1x20xf32, #tpu.memory_space<vmem>>, %arg6: memref<8x20xf32, #tpu.memory_space<vmem>>) attributes {dimension_semantics = [#tpu.dimension_semantics<parallel>], iteration_bounds = array<i64: 1>, scalar_prefetch = 0 : i64, scratch_operands = 0 : i64, tpu.core_type = #tpu.core_type<tc>, window_params = [{transform_indices = @transform_0, window_bounds = array<i64: 8, 32>}, {pipeline_mode = #tpu.pipeline_mode<synchronous>, transform_indices = @transform_1, window_bounds = array<i64: 32, 8>}, {pipeline_mode = #tpu.pipeline_mode<synchronous>, transform_indices = @transform_2, window_bounds = array<i64: 1, 8>}, {pipeline_mode = #tpu.pipeline_mode<synchronous>, transform_indices = @transform_3, window_bounds = array<i64: 8, 20>}, {pipeline_mode = #tpu.pipeline_mode<synchronous>, transform_indices = @transform_4, window_bounds = array<i64: 1, 20>}, {transform_indices = @transform_5, window_bounds = array<i64: 8, 20>}]} {
    %c0 = arith.constant 0 : index
    %c0_0 = arith.constant 0 : index
    %0 = vector.load %arg1[%c0, %c0_0] : memref<8x32xf32, #tpu.memory_space<vmem>>, vector<8x32xf32>
    %c0_1 = arith.constant 0 : index
    %c0_2 = arith.constant 0 : index
    %1 = vector.load %arg2[%c0_1, %c0_2] : memref<32x8xf32, #tpu.memory_space<vmem>>, vector<32x8xf32>
    %cst = arith.constant dense<0.000000e+00> : vector<8x8xf32>
    %2 = tpu.matmul %0, %1, %cst {dimension_numbers = #tpu.dot_dimension_numbers<[1], [0], [0], [1], [0, 0, 1, 1], [], []>} : vector<8x32xf32>, vector<32x8xf32>, vector<8x8xf32> -> vector<8x8xf32>
    %c0_3 = arith.constant 0 : index
    %c0_4 = arith.constant 0 : index
    %3 = vector.load %arg3[%c0_3, %c0_4] : memref<1x8xf32, #tpu.memory_space<vmem>>, vector<1x8xf32>
    %4 = vector.broadcast %3 : vector<1x8xf32> to vector<8x8xf32>
    %5 = arith.addf %2, %4 : vector<8x8xf32>
    %cst_5 = arith.constant 0.000000e+00 : f32
    %6 = vector.broadcast %cst_5 : f32 to vector<8x8xf32>
    %7 = arith.maximumf %5, %6 : vector<8x8xf32>
    %c0_6 = arith.constant 0 : index
    %c0_7 = arith.constant 0 : index
    %8 = vector.load %arg4[%c0_6, %c0_7] : memref<8x20xf32, #tpu.memory_space<vmem>>, vector<8x20xf32>
    %cst_8 = arith.constant dense<0.000000e+00> : vector<8x20xf32>
    %9 = tpu.matmul %7, %8, %cst_8 {dimension_numbers = #tpu.dot_dimension_numbers<[1], [0], [0], [1], [0, 0, 1, 1], [], []>} : vector<8x8xf32>, vector<8x20xf32>, vector<8x20xf32> -> vector<8x20xf32>
    %c0_9 = arith.constant 0 : index
    %c0_10 = arith.constant 0 : index
    %10 = vector.load %arg5[%c0_9, %c0_10] : memref<1x20xf32, #tpu.memory_space<vmem>>, vector<1x20xf32>
    %11 = vector.broadcast %10 : vector<1x20xf32> to vector<8x20xf32>
    %12 = arith.addf %9, %11 : vector<8x20xf32>
    %cst_11 = arith.constant dense<0xFF800000> : vector<8xf32>
    %13 = vector.multi_reduction <maximumf>, %12, %cst_11 [1] : vector<8x20xf32> to vector<8xf32>
    %14 = vector.shape_cast %13 : vector<8xf32> to vector<8x1xf32>
    %15 = vector.broadcast %14 : vector<8x1xf32> to vector<8x20xf32>
    %16 = arith.subf %12, %15 : vector<8x20xf32>
    %17 = math.exp %16 : vector<8x20xf32>
    %cst_12 = arith.constant dense<0.000000e+00> : vector<8xf32>
    %18 = vector.multi_reduction <add>, %17, %cst_12 [1] : vector<8x20xf32> to vector<8xf32>
    %19 = vector.shape_cast %18 : vector<8xf32> to vector<8x1xf32>
    %20 = tpu.reciprocal %19 {approx = true} : vector<8x1xf32> -> vector<8x1xf32>
    %21 = vector.broadcast %20 : vector<8x1xf32> to vector<8x20xf32>
    %22 = arith.mulf %17, %21 : vector<8x20xf32>
    %c0_13 = arith.constant 0 : index
    %c0_14 = arith.constant 0 : index
    %23 = vector.load %arg6[%c0_13, %c0_14] : memref<8x20xf32, #tpu.memory_space<vmem>>, vector<8x20xf32>
    tpu.vector_store %arg6[%c0_13, %c0_14], %22 {strides = array<i32>} : memref<8x20xf32, #tpu.memory_space<vmem>>, vector<8x20xf32>,
    return
  }
  func.func @transform_0(%arg0: i32) -> (i32, i32) {
    %c0_i32 = arith.constant 0 : i32
    %c0_i32_0 = arith.constant 0 : i32
    return %arg0, %c0_i32 : i32, i32
  }
  func.func @transform_1(%arg0: i32) -> (i32, i32) {
    %c0_i32 = arith.constant 0 : i32
    %c0_i32_0 = arith.constant 0 : i32
    %c0_i32_1 = arith.constant 0 : i32
    return %c0_i32, %c0_i32_0 : i32, i32
  }
  func.func @transform_2(%arg0: i32) -> (i32, i32) {
    %c0_i32 = arith.constant 0 : i32
    %c0_i32_0 = arith.constant 0 : i32
    %c0_i32_1 = arith.constant 0 : i32
    return %c0_i32, %c0_i32_0 : i32, i32
  }
  func.func @transform_3(%arg0: i32) -> (i32, i32) {
    %c0_i32 = arith.constant 0 : i32
    %c0_i32_0 = arith.constant 0 : i32
    %c0_i32_1 = arith.constant 0 : i32
    return %c0_i32, %c0_i32_0 : i32, i32
  }
  func.func @transform_4(%arg0: i32) -> (i32, i32) {
    %c0_i32 = arith.constant 0 : i32
    %c0_i32_0 = arith.constant 0 : i32
    %c0_i32_1 = arith.constant 0 : i32
    return %c0_i32, %c0_i32_0 : i32, i32
  }
  func.func @transform_5(%arg0: i32) -> (i32, i32) {
    %c0_i32 = arith.constant 0 : i32
    %c0_i32_0 = arith.constant 0 : i32
    return %arg0, %c0_i32 : i32, i32
  }
}

</mosaic_0001>

<bundles_post_ra>
// kernel: tpu_custom_call.1
= control target key start
LH: loop header
LB: loop body
LE: loop exit
PB: predicated region body
PF: predicated region fallthrough
CT: control target
= control target key end

     0   :  { %s209_s0 = inlined_call_operand.vmem [shape: f32[8,32], index: 0, kind: input, shape index: {}]   ;;  %s210_s1 = inlined_call_operand.vmem [shape: f32[32,8], index: 1, kind: input, shape index: {}]   ;;  %s211_s2 = inlined_call_operand.vmem [shape: f32[1,8], index: 2, kind: input, shape index: {}]   ;;  %s212_s3 = inlined_call_operand.vmem [shape: f32[8,20], index: 3, kind: input, shape index: {}]   ;;  %s213_s4 = inlined_call_operand.vmem [shape: f32[1,20], index: 4, kind: input, shape index: {}]   ;;  %s214_s5 = inlined_call_operand.hbm [shape: f32[8,20], index: 5, kind: output, shape index: {}]  }
   0x1   :  { %v25_v0 = vld [vmem:[%s210_s1 + $0x18] sm:$0xff]  ;;  %v24_v1 = vld [vmem:[%s210_s1 + $0x10] sm:$0xff]  ;;  %v23_v2 = vld [vmem:[%s210_s1 + $0x8] sm:$0xff] }
   0x2   :  { %46 = vmatpush.msra.mxu0 %v25_v0 }
   0x3   :  { %10 = vsyncpa [#allocation3], 0  ;;  %v22_v3 = vld [vmem:[%s210_s1] sm:$0xff]  ;;  %vm30_vm0 = vcmask 261120   ;;  %vm60_vm1 = vcmask 64512   ;;  %vm84_vm2 = vcmask 162816  }
   0x4   :  { %47 = vmatpush.msra.mxu0 %v24_v1  ;;  %v21_v4 = vld [vmem:[%s209_s0] sm:$0xff]  ;;  %s148_s0 = smov [#allocation2]   ;;  %s104_s8 = sshll.u32 %s214_s5, 4  ;;  %s105_s8 = int_to_ptr.hbm [resolvable:$true] %s104_s8 }
   0x5   :  { %v55_v5 = vld [vmem:[%s212_s3] sm:$0xff] }
   0x6   :  { %48 = vmatpush.msra.mxu0 %v23_v2  ;;  %79 = vmatpush.msra.mxu1 %v55_v5  ;;  %v116_v6 = vld [vmem:[%s211_s2] ss:$0 sm:$0xff]  ;;  %s102_s2 = sshll.u32 %s148_s0, 4  ;;  %s103_s2 = int_to_ptr.vmem [resolvable:$true] %s102_s2 }
   0x7   :  { %v117_v10 = vld [vmem:[%s213_s4] ss:$0 sm:$0xff] }
   0x8   :  { %49 = vmatpush.msra.mxu0 %v22_v3 }
   0x9   :  { %113 = vmatmul.msk.f32.vlgmr.msra.gmra.mxu0 %vm30_vm0, %v21_v4 }
  0x86   :  { %v51_v7 = vpop.f32.mrf.mxu0 }
  0x87   :  { %v52_v8 = vadd.f32 %v116_v6, %v51_v7 }
  0x89   :  { %v54_v9 = vmax.f32 %v52_v8, 0.0 }
  0x8b   :  { %114 = vmatmul.msk.f32.vlgmr.msra.gmra.mxu1 %vm60_vm1, %v54_v9 }
 0x108   :  { %v81_v11 = vpop.f32.mrf.mxu1 }
 0x109   :  { %v82_v12 = vadd.f32 %v117_v10, %v81_v11 }
 0x10b   :  { %v85_v13 = vsel %vm84_vm2, %v82_v12, -inf }
 0x10c   :  { %86 = vmax.xlane.f32.xlu0 %v85_v13 }
 0x17f   :  { %v87_v14 = vpop.xlane.xlu0 %86 }
 0x180   :  { %v88_v15 = vsub.f32 %v82_v12, %v87_v14 }
 0x182   :  { %v89_v16 = vmul.f32 1.442695, %v88_v15 }
 0x184   :  { %118 = vpow2.f32 %v89_v16 }
 0x18a   :  { %v119_v17 = vpop.eup %118 }
 0x18b   :  { %v91_v18 = vsel %vm84_vm2, %v119_v17, 0.0 }
 0x18c   :  { %92 = vadd.xlane.f32.xlu0 %v91_v18 }
 0x1ff   :  { %v93_v19 = vpop.xlane.xlu0 %92 }
 0x200   :  { %120 = vrcp.f32 %v93_v19 }
 0x206   :  { %v121_v20 = vpop.eup %120 }
 0x207   :  { %v95_v21 = vmul.f32 %v121_v20, %v119_v17 }
 0x209   :  { %96 = vst.msk [vmem:[#allocation2] sm:$0xff] %vm84_vm2, %v95_v21 }
 0x20a   :  { %107 = dma.vmem_to_hbm [thread:$0]  %s103_s2, 128, %s105_s8, [#allocation3]  }
 0x20b   :  { %146 = dma.done.wait [#allocation3], 128  }
 0x20c   :  { %147 = vsyncadd [#allocation3], 4294967168 }
 0x20d   :  { %112 = vsyncpa [#allocation3], 1 }

</bundles_post_ra>
